<compile_context>
chip_gen: v6e
topology: v6e:2x2x1
jax: 0.10.0
libtpu: 0.0.40
codegen_flags: <defaults>
</compile_context>

<pallas_src>
import functools

import jax
import jax.numpy as jnp
from jax.experimental import pallas as pl
from jax.experimental.pallas import tpu as pltpu


def _cl_loss_kernel(simi_ref, out_ref, *, batch_size, rep, bias, n_rows, tile_m):
    i = pl.program_id(0)
    row0 = i * tile_m

    # Load the row tile and cast to f32 in-kernel (input may be bf16).
    simi = simi_ref[...].astype(jnp.float32)          # (tile_m, n)
    n = simi.shape[1]

    # Structural masks generated on the fly (no HBM mask operands).
    row_ids = jax.lax.broadcasted_iota(jnp.int32, (tile_m, 1), 0) + row0   # (tile_m, 1)
    col_ids = jax.lax.broadcasted_iota(jnp.int32, (1, n), 1)               # (1, n)
    is_diag = row_ids == col_ids                                           # (tile_m, n)
    same_item = (row_ids % batch_size) == (col_ids % batch_size)           # (tile_m, n)
    is_pos = same_item & jnp.logical_not(is_diag)

    # simi = simi - rowmax(simi)
    simi_max = jnp.max(simi, axis=1, keepdims=True)
    shifted = simi - simi_max

    # positives = sum(shifted * pos_mask) / (rep - 1)   (constant divisor)
    inv_pos = 1.0 / (rep - 1) if rep > 1 else float("nan")  # rep==1 -> NaN like torch 0/0
    positives = jnp.sum(jnp.where(is_pos, shifted, 0.0), axis=1, keepdims=True) * inv_pos

    # negatives = sum(exp(shifted) * (1 - eye))  == rowsum with diag zeroed
    negatives = jnp.sum(jnp.where(is_diag, 0.0, jnp.exp(shifted)),
                        axis=1, keepdims=True)

    term = positives - jnp.log(negatives + bias)       # (tile_m, 1) per-row loss term

    # Mask rows of a ragged last tile (block may extend past n_rows).
    row_valid = row_ids < n_rows
    partial = jnp.sum(jnp.where(row_valid, term, 0.0))

    # Lane-dense, unmasked store of this tile's partial sum.
    out_ref[...] = jnp.full((1, 8, 128), partial, dtype=jnp.float32)


def _choose_tile_m(n, itemsize, vmem_budget_bytes=24 << 20, max_tile_m=512):
    """Rows per tile: 2 pipeline buffers of the input + ~4 f32 temps per elem."""
    bytes_per_row = n * (2 * itemsize + 16)
    tm = vmem_budget_bytes // max(bytes_per_row, 1)
    tm = int(min(tm, max_tile_m, n))
    if tm >= n:
        return n
    return max(8, (tm // 8) * 8)


def cl_loss(simi, batch_size, rep=3, bias=0.0, tile_m=None):
    n = simi.shape[0]
    assert simi.shape == (n, n)
    assert n == batch_size * rep

    if tile_m is None:
        tile_m = _choose_tile_m(n, jnp.dtype(simi.dtype).itemsize)
    tile_m = min(int(tile_m), n)
    if tile_m < n:
        tile_m = max(8, (tile_m // 8) * 8)
    num_tiles = pl.cdiv(n, tile_m)

    kernel = functools.partial(
        _cl_loss_kernel,
        batch_size=int(batch_size), rep=int(rep),
        bias=float(bias), n_rows=int(n), tile_m=int(tile_m),
    )

    partials = pl.pallas_call(
        kernel,
        out_shape=jax.ShapeDtypeStruct((num_tiles, 8, 128), jnp.float32),
        grid=(num_tiles,),
        in_specs=[pl.BlockSpec((tile_m, n), lambda i: (i, 0))],
        out_specs=pl.BlockSpec((1, 8, 128), lambda i: (i, 0, 0)),
        compiler_params=pltpu.CompilerParams(
            dimension_semantics=("parallel",),
        ),
    )(simi)

    return -(jnp.sum(partials[:, 0, 0]) / n)


def cl_loss_reference(simi, batch_size, rep=3, bias=0.0):
    """Pure-JAX mirror of the PyTorch module (builds the same buffers)."""
    n = batch_size * rep
    eye = jnp.eye(n, dtype=bool)
    neg_mask = (~eye).astype(jnp.float32)
    iids = jnp.tile(jnp.arange(batch_size), rep)
    pos_mask = ((iids[:, None] == iids[None, :]) & (~eye)).astype(jnp.float32)

    simi = simi.astype(jnp.float32)
    simi = simi - jnp.max(simi, axis=1, keepdims=True)
    positives = jnp.sum(simi * pos_mask, axis=1) / jnp.sum(pos_mask, axis=1)
    negatives = jnp.sum(jnp.exp(simi) * neg_mask, axis=1)
    return -jnp.mean(positives - jnp.log(negatives + bias))


if __name__ == "__main__":
    key = jax.random.PRNGKey(0)
    k1, k2 = jax.random.split(key)

    # Case 1: module defaults at a small size (single full-array tile).
    bs, rep, bias = 8, 3, 0.0
    n = bs * rep                                      # 24
    simi = jax.random.normal(k1, (n, n), dtype=jnp.float32)
    loss = jax.block_until_ready(cl_loss(simi, bs, rep, bias))
    ref = cl_loss_reference(simi, bs, rep, bias)
    assert jnp.allclose(loss, ref, atol=1e-5, rtol=1e-5), (loss, ref)

    # Case 2: forced row tiling with a ragged last tile (exercises the grid,
    # the in-kernel masks, and the padded-row masking path).
    bs2, rep2 = 40, 3
    n2 = bs2 * rep2                                   # 120, tile_m=48 -> 3 tiles
    simi2 = jax.random.normal(k2, (n2, n2), dtype=jnp.float32)
    loss2 = jax.block_until_ready(cl_loss(simi2, bs2, rep2, bias, tile_m=48))
    ref2 = cl_loss_reference(simi2, bs2, rep2, bias)
    assert jnp.allclose(loss2, ref2, atol=1e-5, rtol=1e-5), (loss2, ref2)

    print("KERNEL_OK")
</pallas_src>

<mosaic_0001>
module attributes {stable_mosaic.version = 11 : i64} {
  func.func @_cl_loss_kernel(%arg0: i32, %arg1: memref<24x24xf32, #tpu.memory_space<vmem>>, %arg2: memref<1x8x128xf32, #tpu.memory_space<vmem>>) attributes {dimension_semantics = [#tpu.dimension_semantics<parallel>], iteration_bounds = array<i64: 1>, scalar_prefetch = 0 : i64, scratch_operands = 0 : i64, tpu.core_type = #tpu.core_type<tc>, window_params = [{transform_indices = @transform_0, window_bounds = array<i64: 24, 24>}, {transform_indices = @transform_1, window_bounds = array<i64: 1, 8, 128>}]} {
    %c24_i32 = arith.constant 24 : i32
    %0 = arith.muli %arg0, %c24_i32 : i32
    %c0 = arith.constant 0 : index
    %c0_0 = arith.constant 0 : index
    %1 = vector.load %arg1[%c0, %c0_0] : memref<24x24xf32, #tpu.memory_space<vmem>>, vector<24x24xf32>
    %2 = tpu.iota {dimensions = array<i32: 0>} : vector<24x1xi32>
    %3 = vector.broadcast %0 : i32 to vector<24x1xi32>
    %4 = arith.addi %2, %3 : vector<24x1xi32>
    %5 = tpu.iota {dimensions = array<i32: 1>} : vector<1x24xi32>
    %6 = vector.broadcast %4 : vector<24x1xi32> to vector<24x24xi32>
    %7 = vector.broadcast %5 : vector<1x24xi32> to vector<24x24xi32>
    %8 = arith.cmpi eq, %6, %7 : vector<24x24xi32>
    %c8_i32 = arith.constant 8 : i32
    %c0_i32 = arith.constant 0 : i32
    %9 = arith.cmpi eq, %c8_i32, %c0_i32 : i32
    %c1_i32 = arith.constant 1 : i32
    %10 = arith.select %9, %c1_i32, %c8_i32 : i32
    %11 = vector.broadcast %10 : i32 to vector<24x1xi32>
    %12 = arith.remsi %4, %11 : vector<24x1xi32>
    %c0_i32_1 = arith.constant 0 : i32
    %13 = vector.broadcast %c0_i32_1 : i32 to vector<24x1xi32>
    %14 = arith.cmpi ne, %12, %13 : vector<24x1xi32>
    %c0_i32_2 = arith.constant 0 : i32
    %15 = vector.broadcast %c0_i32_2 : i32 to vector<24x1xi32>
    %16 = arith.cmpi slt, %12, %15 : vector<24x1xi32>
    %c0_i32_3 = arith.constant 0 : i32
    %17 = arith.cmpi slt, %10, %c0_i32_3 : i32
    %18 = vector.broadcast %17 : i1 to vector<24x1xi1>
    %19 = vector.broadcast %18 : vector<24x1xi1> to vector<24x1xi1>
    %20 = arith.xori %16, %19 : vector<24x1xi1>
    %21 = arith.andi %20, %14 : vector<24x1xi1>
    %22 = vector.broadcast %10 : i32 to vector<24x1xi32>
    %23 = arith.addi %12, %22 : vector<24x1xi32>
    %24 = arith.select %21, %23, %12 : vector<24x1xi1>, vector<24x1xi32>
    %c8_i32_4 = arith.constant 8 : i32
    %c0_i32_5 = arith.constant 0 : i32
    %25 = arith.cmpi eq, %c8_i32_4, %c0_i32_5 : i32
    %c1_i32_6 = arith.constant 1 : i32
    %26 = arith.select %25, %c1_i32_6, %c8_i32_4 : i32
    %27 = vector.broadcast %26 : i32 to vector<1x24xi32>
    %28 = arith.remsi %5, %27 : vector<1x24xi32>
    %c0_i32_7 = arith.constant 0 : i32
    %29 = vector.broadcast %c0_i32_7 : i32 to vector<1x24xi32>
    %30 = arith.cmpi ne, %28, %29 : vector<1x24xi32>
    %c0_i32_8 = arith.constant 0 : i32
    %31 = vector.broadcast %c0_i32_8 : i32 to vector<1x24xi32>
    %32 = arith.cmpi slt, %28, %31 : vector<1x24xi32>
    %c0_i32_9 = arith.constant 0 : i32
    %33 = arith.cmpi slt, %26, %c0_i32_9 : i32
    %34 = vector.broadcast %33 : i1 to vector<1x24xi1>
    %35 = vector.broadcast %34 : vector<1x24xi1> to vector<1x24xi1>
    %36 = arith.xori %32, %35 : vector<1x24xi1>
    %37 = arith.andi %36, %30 : vector<1x24xi1>
    %38 = vector.broadcast %26 : i32 to vector<1x24xi32>
    %39 = arith.addi %28, %38 : vector<1x24xi32>
    %40 = arith.select %37, %39, %28 : vector<1x24xi1>, vector<1x24xi32>
    %41 = vector.broadcast %24 : vector<24x1xi32> to vector<24x24xi32>
    %42 = vector.broadcast %40 : vector<1x24xi32> to vector<24x24xi32>
    %43 = arith.cmpi eq, %41, %42 : vector<24x24xi32>
    %cst = arith.constant dense<true> : vector<24x24xi1>
    %44 = arith.xori %8, %cst : vector<24x24xi1>
    %45 = arith.andi %43, %44 : vector<24x24xi1>
    %cst_10 = arith.constant dense<0xFF800000> : vector<24xf32>
    %46 = vector.multi_reduction <maximumf>, %1, %cst_10 [1] : vector<24x24xf32> to vector<24xf32>
    %47 = vector.shape_cast %46 : vector<24xf32> to vector<24x1xf32>
    %48 = vector.broadcast %47 : vector<24x1xf32> to vector<24x24xf32>
    %49 = arith.subf %1, %48 : vector<24x24xf32>
    %cst_11 = arith.constant 0.000000e+00 : f32
    %50 = vector.broadcast %cst_11 : f32 to vector<24x24xf32>
    %51 = arith.select %45, %49, %50 : vector<24x24xi1>, vector<24x24xf32>
    %cst_12 = arith.constant dense<0.000000e+00> : vector<24xf32>
    %52 = vector.multi_reduction <add>, %51, %cst_12 [1] : vector<24x24xf32> to vector<24xf32>
    %53 = vector.shape_cast %52 : vector<24xf32> to vector<24x1xf32>
    %cst_13 = arith.constant 5.000000e-01 : f32
    %54 = vector.broadcast %cst_13 : f32 to vector<24x1xf32>
    %55 = arith.mulf %53, %54 : vector<24x1xf32>
    %56 = math.exp %49 : vector<24x24xf32>
    %cst_14 = arith.constant 0.000000e+00 : f32
    %57 = vector.broadcast %cst_14 : f32 to vector<24x24xf32>
    %58 = arith.select %8, %57, %56 : vector<24x24xi1>, vector<24x24xf32>
    %cst_15 = arith.constant dense<0.000000e+00> : vector<24xf32>
    %59 = vector.multi_reduction <add>, %58, %cst_15 [1] : vector<24x24xf32> to vector<24xf32>
    %60 = vector.shape_cast %59 : vector<24xf32> to vector<24x1xf32>
    %cst_16 = arith.constant 0.000000e+00 : f32
    %61 = vector.broadcast %cst_16 : f32 to vector<24x1xf32>
    %62 = arith.addf %60, %61 : vector<24x1xf32>
    %63 = math.log %62 : vector<24x1xf32>
    %64 = arith.subf %55, %63 : vector<24x1xf32>
    %c24_i32_17 = arith.constant 24 : i32
    %65 = vector.broadcast %c24_i32_17 : i32 to vector<24x1xi32>
    %66 = arith.cmpi slt, %4, %65 : vector<24x1xi32>
    %cst_18 = arith.constant 0.000000e+00 : f32
    %67 = vector.broadcast %cst_18 : f32 to vector<24x1xf32>
    %68 = arith.select %66, %64, %67 : vector<24x1xi1>, vector<24x1xf32>
    %69 = vector.shape_cast %68 : vector<24x1xf32> to vector<1x24x1xf32>
    %cst_19 = arith.constant dense<0.000000e+00> : vector<1xf32>
    %70 = vector.multi_reduction <add>, %69, %cst_19 [1, 2] : vector<1x24x1xf32> to vector<1xf32>
    %71 = vector.shape_cast %70 : vector<1xf32> to vector<1x1x1xf32>
    %72 = vector.extract %71[0, 0, 0] : f32 from vector<1x1x1xf32>
    %73 = vector.broadcast %72 : f32 to vector<1x8x128xf32>
    %c0_20 = arith.constant 0 : index
    %c0_21 = arith.constant 0 : index
    %c0_22 = arith.constant 0 : index
    %74 = vector.load %arg2[%c0_20, %c0_21, %c0_22] : memref<1x8x128xf32, #tpu.memory_space<vmem>>, vector<1x8x128xf32>
    tpu.vector_store %arg2[%c0_20, %c0_21, %c0_22], %73 {strides = array<i32>} : memref<1x8x128xf32, #tpu.memory_space<vmem>>, vector<1x8x128xf32>,
    return
  }
  func.func @transform_0(%arg0: i32) -> (i32, i32) {
    %c0_i32 = arith.constant 0 : i32
    %c0_i32_0 = arith.constant 0 : i32
    return %arg0, %c0_i32 : i32, i32
  }
  func.func @transform_1(%arg0: i32) -> (i32, i32, i32) {
    %c0_i32 = arith.constant 0 : i32
    %c0_i32_0 = arith.constant 0 : i32
    %c0_i32_1 = arith.constant 0 : i32
    return %arg0, %c0_i32, %c0_i32_0 : i32, i32, i32
  }
}

</mosaic_0001>

<bundles_post_ra>
// kernel: tpu_custom_call.1
= control target key start
LH: loop header
LB: loop body
LE: loop exit
PB: predicated region body
PF: predicated region fallthrough
CT: control target
= control target key end

     0   :  { %6 = vsyncpa [#allocation3], 0  ;;  %s315_s0 = inlined_call_operand.hbm [shape: f32[24,24], index: 0, kind: input, shape index: {}]   ;;  %s316_s1 = inlined_call_operand.hbm [shape: f32[1,8,128], index: 1, kind: output, shape index: {}]  }
   0x1   :  { %7 = vsyncpa [#allocation4], 0  ;;  %s256_s6 = smov [#allocation2]  }
   0x2   :  { %s13_s7 = sshll.u32 %s256_s6, 4  ;;  %s14_s7 = int_to_ptr.vmem [resolvable:$true] %s13_s7 }
   0x3   :  { %s220_s8 = scalar_lea.vmem %s14_s7, 384  ;;  %p225_p1 = scmp.lt.s32.totalorder %s14_s7, %s14_s7 }
   0x4   :  { %p221_p0 = scmp.ne.s32.totalorder %s14_s7, %s220_s8  ;;  %p226_p2 = scmp.lt.s32.totalorder %s220_s8, %s220_s8 }
   0x6   :  { %p227_p3 = por %p226_p2, %p225_p1 }
   0x8   :  { %p228_p4 = pnand %p227_p3, %p221_p0 }
   0xa   :  { %231 = shalt.err (!%p228_p4)
}
   0xb   :  { %s257_s9 = smov 128   ;;  %s258_s10 = smov 8  }
   0xc   :  { %19 = dma.hbm_to_vmem [thread:$0]  %s315_s0, 384, %s14_s7, [#allocation3], %s257_s9, %s257_s9, %s258_s10  }
   0xd   :  { %252 = dma.done.wait [#allocation3], 384  }
   0xe   :  { %253 = vsyncadd [#allocation3], 4294966912  ;;  %vm97_vm0 = vcmask 195584   ;;  %v24_v0 = vld [vmem:[#allocation2] sm:$0xff]  ;;  %v26_v1 = vld [vmem:[#allocation2 + $0x10] sm:$0xff]  ;;  %v27_v14 = vlaneseq  ;;  %vm259_vm4 = vmmov 1  }
   0xf   :  { %v25_v2 = vld [vmem:[#allocation2 + $0x8] sm:$0xff]  ;;  %v98_v3 = vsel %vm97_vm0, %v24_v0, -inf  ;;  %v104_v4 = vsel %vm97_vm0, %v26_v1, -inf  ;;  %vm161_vm14 = vcmask 7168   ;;  %s260_s0 = smov [#allocation5]  }
  0x10   :  { %99 = vmax.xlane.f32.xlu0 %v98_v3  ;;  %105 = vmax.xlane.f32.xlu1 %v104_v4  ;;  %v101_v5 = vsel %vm97_vm0, %v25_v2, -inf  ;;  %v28_v16 = vshrl.u32 %v27_v14, 7  ;;  %v36_v17 = vand.u32 127, %v27_v14  ;;  %s184_s13 = sshll.u32 %s260_s0, 4  ;;  %s185_s13 = int_to_ptr.vmem [resolvable:$true] %s184_s13 }
  0x11   :  { %s232_s15 = scalar_lea.vmem %s185_s13, 128  ;;  %p237_p6 = scmp.lt.s32.totalorder %s185_s13, %s185_s13 }
  0x12   :  { %v29_v18 = vadd.s32 8, %v28_v16  ;;  %v44_v19 = vand.u32 7, %v28_v16  ;;  %v80_v20 = vand.u32 7, %v36_v17  ;;  %vm37_vm1 = vcmp.eq.s32.totalorder %v28_v16, %v36_v17  ;;  %p233_p5 = scmp.ne.s32.totalorder %s185_s13, %s232_s15  ;;  %p238_p7 = scmp.lt.s32.totalorder %s232_s15, %s232_s15 }
  0x13   :  { %v30_v21 = vadd.s32 16, %v28_v16  ;;  %vm282_vm5 = vmxor %vm37_vm1, %vm259_vm4 }
  0x14   :  { %102 = vmax.xlane.f32.xlu0 %v101_v5  ;;  %v51_v22 = vand.u32 7, %v29_v18  ;;  %vm38_vm2 = vcmp.eq.s32.totalorder %v29_v18, %v36_v17  ;;  %vm277_vm3 = vcmp.eq.s32.totalorder %v44_v19, %v80_v20  ;;  %p239_p8 = por %p238_p7, %p237_p6 }
  0x15   :  { %vm39_vm6 = vcmp.eq.s32.totalorder %v30_v21, %v36_v17  ;;  %vm292_vm8 = vmxor %vm38_vm2, %vm259_vm4  ;;  %v58_v30 = vand.u32 7, %v30_v21 }
  0x16   :  { %vm286_vm7 = vcmp.eq.s32.totalorder %v51_v22, %v80_v20  ;;  %vm94_vm9 = vmand %vm277_vm3, %vm282_vm5  ;;  %p240_p9 = pnand %p239_p8, %p233_p5 }
  0x17   :  { %vm95_vm10 = vmand %vm286_vm7, %vm292_vm8  ;;  %vm90_vm11 = vcmp.eq.s32.totalorder %v58_v30, %v80_v20 }
  0x18   :  { %vm93_vm12 = vmxor %vm39_vm6, %vm259_vm4 }
  0x19   :  { %vm96_vm13 = vmand %vm90_vm11, %vm93_vm12 }
  0x99   :  { %v100_v6 = vpop.xlane.xlu0 %99  ;;  %v106_v7 = vpop.xlane.xlu1 %105 }
  0x9a   :  { %v107_v8 = vsub.f32 %v24_v0, %v100_v6  ;;  %v109_v9 = vsub.f32 %v26_v1, %v106_v7 }
  0x9c   :  { %v125_v10 = vmul.f32 1.442695, %v107_v8  ;;  %v129_v11 = vmul.f32 1.442695, %v109_v9  ;;  %v110_v37 = vsel %vm94_vm9, %v107_v8, 0.0  ;;  %v112_v41 = vsel %vm96_vm13, %v109_v9, 0.0 }
  0x9d   :  { %v103_v12 = vpop.xlane.xlu0 %102  ;;  %v113_v39 = vsel %vm97_vm0, %v110_v37, 0.0  ;;  %v119_v42 = vsel %vm97_vm0, %v112_v41, 0.0 }
  0x9e   :  { %200 = vpow2.f32 %v125_v10  ;;  %v108_v13 = vsub.f32 %v25_v2, %v103_v12 }
  0x9f   :  { %202 = vpow2.f32 %v129_v11 }
  0xa0   :  { %v127_v15 = vmul.f32 1.442695, %v108_v13  ;;  %v111_v38 = vsel %vm95_vm10, %v108_v13, 0.0 }
  0xa1   :  { %v116_v40 = vsel %vm97_vm0, %v111_v38, 0.0 }
  0xa2   :  { %204 = vpow2.f32 %v127_v15 }
  0xab   :  { %v201_v23 = vpop.eup %200 }
  0xac   :  { %v203_v26 = vpop.eup %202  ;;  %v131_v27 = vsel %vm37_vm1, 0.0, %v201_v23 }
  0xad   :  { %v134_v31 = vsel %vm97_vm0, %v131_v27, 0.0  ;;  %v133_v32 = vsel %vm39_vm6, 0.0, %v203_v26 }
  0xae   :  { %135 = vadd.xlane.f32.xlu1 %v134_v31  ;;  %v140_v34 = vsel %vm97_vm0, %v133_v32, 0.0 }
  0xaf   :  { %v205_v33 = vpop.eup %204 }
  0xb0   :  { %v132_v35 = vsel %vm38_vm2, 0.0, %v205_v33 }
  0xb1   :  { %v137_v36 = vsel %vm97_vm0, %v132_v35, 0.0 }
  0xb2   :  { %141 = vadd.xlane.f32.xlu1 %v140_v34  ;;  %138 = vadd.xlane.f32.xlu0 %v137_v36 }
  0xb6   :  { %114 = vadd.xlane.f32.xlu0 %v113_v39  ;;  %117 = vadd.xlane.f32.xlu1 %v116_v40 }
  0xba   :  { %120 = vadd.xlane.f32.xlu0 %v119_v42 }
 0x137   :  { %v136_v43 = vpop.xlane.xlu1 %135 }
 0x138   :  { %206 = vlog2.f32 %v136_v43 }
 0x13b   :  { %v142_v44 = vpop.xlane.xlu1 %141  ;;  %v139_v45 = vpop.xlane.xlu0 %138 }
 0x13c   :  { %208 = vlog2.f32 %v142_v44 }
 0x13d   :  { %210 = vlog2.f32 %v139_v45 }
 0x13f   :  { %v115_v46 = vpop.xlane.xlu0 %114  ;;  %v118_v49 = vpop.xlane.xlu1 %117 }
 0x140   :  { %v122_v52 = vmul.f32 0.5, %v115_v46  ;;  %v123_v57 = vmul.f32 0.5, %v118_v49 }
 0x143   :  { %v121_v50 = vpop.xlane.xlu0 %120 }
 0x144   :  { %v124_v58 = vmul.f32 0.5, %v121_v50 }
 0x145   :  { %v207_v47 = vpop.eup %206 }
 0x146   :  { %v147_v48 = vmul.f32 0.6931472, %v207_v47 }
 0x148   :  { %v152_v56 = vsub.f32 %v122_v52, %v147_v48 }
 0x149   :  { %v209_v51 = vpop.eup %208 }
 0x14a   :  { %v211_v53 = vpop.eup %210  ;;  %v151_v54 = vmul.f32 0.6931472, %v209_v51  ;;  %v162_v61 = vsel %vm161_vm14, %v152_v56, 0.0 }
 0x14b   :  { %v149_v55 = vmul.f32 0.6931472, %v211_v53 }
 0x14c   :  { %v154_v60 = vsub.f32 %v124_v58, %v151_v54 }
 0x14d   :  { %v153_v59 = vsub.f32 %v123_v57, %v149_v55 }
 0x14e   :  { %v165_v0 = vsel %vm161_vm14, %v154_v60, 0.0 }
 0x14f   :  { %v163_v62 = vsel %vm161_vm14, %v153_v59, 0.0 }
 0x150   :  { %v164_v63 = vadd.f32 %v163_v62, %v162_v61 }
 0x152   :  { %v166_v1 = vadd.f32 %v165_v0, %v164_v63 }
 0x154   :  { %167 = vadd.xlane.f32.xlu1 %v166_v1 }
 0x1dd   :  { %v168_v2 = vpop.xlane.xlu1 %167 }
 0x1de   :  { %v169_v3 = vrot.slane %v168_v2, 4 }
 0x1e0   :  { %v170_v4 = vadd.f32 %v169_v3, %v168_v2 }
 0x1e2   :  { %v171_v5 = vrot.slane %v170_v4, 2 }
 0x1e4   :  { %v172_v6 = vadd.f32 %v171_v5, %v170_v4 }
 0x1e6   :  { %v173_v7 = vrot.slane %v172_v6, 1 }
 0x1e8   :  { %v174_v8 = vadd.f32 %v173_v7, %v172_v6 }
 0x1ea   :  { %193 = vpush %v174_v8 }
 0x21b   :  { %s194_s14 = spop %193 }
 0x21c   :  { %v176_v9 = vstv %s194_s14 }
 0x21d   :  { %177 = vst [vmem:[#allocation5] sm:$0xff] %v176_v9 }
 0x21e   :  { %243 = shalt.err (!%p240_p9)
}
 0x21f   :  { %187 = dma.vmem_to_hbm [thread:$0]  %s185_s13, 128, %s316_s1, [#allocation4]  }
 0x220   :  { %254 = dma.done.wait [#allocation4], 128  }
 0x221   :  { %255 = vsyncadd [#allocation4], 4294967168 }
 0x222   :  { %191 = vsyncpa [#allocation3], 1 }
 0x223   :  { %192 = vsyncpa [#allocation4], 1 }

</bundles_post_ra>
